<compile_context>
chip_gen: v7x
topology: tpu7x:2x2x1
jax: 0.10.0
libtpu: 0.0.40
codegen_flags: <defaults>
</compile_context>

<pallas_src>
import functools

import jax
import jax.numpy as jnp
from jax.experimental import pallas as pl
from jax.experimental.pallas import tpu as pltpu


def _round_up(x, m):
    return ((x + m - 1) // m) * m


def _vmem_params():
    """Generation-aware (tile_budget, stationary_weight_limit, vmem_limit_cap)."""
    cap = 64 * 1024 * 1024
    try:
        cap = int(pltpu.get_tpu_info().vmem_capacity_bytes)
    except Exception:
        pass  # conservative 64 MiB fallback
    if cap >= 128 * 1024 * 1024:          # v5e / v6e: 128 MiB physical VMEM
        return 88 << 20, 16 << 20, 100 << 20
    return 40 << 20, 8 << 20, 48 << 20    # v7x: 64 MiB physical VMEM


# ----------------------------- kernels --------------------------------------

def _lane_reduce_kernel(x_ref, w_ref, *rest, k, d_in, aggr, scale):
    # Path A: x_ref is (tn, K*Din) lane-dense (Din % 128 == 0).  The K-group
    # reduction uses static 128-aligned lane slices (no relayout), sum/mean
    # accumulate in f32, then one (tn, Din) @ (Din, tdo) MXU dot.
    if len(rest) == 2:
        b_ref, o_ref = rest
    else:
        (o_ref,) = rest
        b_ref = None
    x = x_ref[...]
    if aggr == "max":
        acc = x[:, :d_in]
        for t in range(1, k):
            acc = jnp.maximum(acc, x[:, t * d_in:(t + 1) * d_in])
    else:
        acc = x[:, :d_in].astype(jnp.float32)
        for t in range(1, k):
            acc = acc + x[:, t * d_in:(t + 1) * d_in].astype(jnp.float32)
        if scale != 1.0:
            acc = acc * jnp.float32(scale)
    out = jnp.dot(acc, w_ref[...], preferred_element_type=jnp.float32)
    if b_ref is not None:
        out = out + b_ref[...]
    o_ref[...] = out.astype(o_ref.dtype)


def _fused_kernel(x_ref, w_ref, *rest, scale):
    # Path B: mean/sum with Din not 128-aligned; reduction folded into a single
    # lane-dense dot against the K-tiled weight.  1/K applied post-dot in f32.
    if len(rest) == 2:
        b_ref, o_ref = rest
    else:
        (o_ref,) = rest
        b_ref = None
    out = jnp.dot(x_ref[...], w_ref[...], preferred_element_type=jnp.float32)
    if scale != 1.0:
        out = out * jnp.float32(scale)
    if b_ref is not None:
        out = out + b_ref[...]
    o_ref[...] = out.astype(o_ref.dtype)


def _reduce_kernel(x_ref, w_ref, *rest, aggr, scale):
    # Path C fallback: (tn, K, Din) tile, reduce over axis 1, then dot.
    if len(rest) == 2:
        b_ref, o_ref = rest
    else:
        (o_ref,) = rest
        b_ref = None
    x = x_ref[...]
    if aggr == "max":
        aggr_x = jnp.max(x, axis=1)
    else:
        aggr_x = jnp.sum(x, axis=1, dtype=jnp.float32)   # f32 accumulate, no copy
        if scale != 1.0:
            aggr_x = aggr_x * jnp.float32(scale)
    out = jnp.dot(aggr_x, w_ref[...], preferred_element_type=jnp.float32)
    if b_ref is not None:
        out = out + b_ref[...]
    o_ref[...] = out.astype(o_ref.dtype)


# ----------------------------- wrapper ---------------------------------------

def neighbor_aggregator(neighbor_features, weight, bias=None, aggr_method="mean"):
    """Pallas implementation of NeighborAggregator.forward.

    neighbor_features: [num_nodes, num_neighbors, input_dim]
    weight:            [input_dim, output_dim]
    bias:              [output_dim] or None
    returns:           [num_nodes, output_dim]
    """
    assert aggr_method in ("mean", "sum", "max")
    n, k, d_in = neighbor_features.shape
    d_in_w, d_out = weight.shape
    assert d_in == d_in_w
    use_bias = bias is not None
    out_dtype = neighbor_features.dtype

    x_item = jnp.dtype(neighbor_features.dtype).itemsize
    w_item = jnp.dtype(weight.dtype).itemsize
    o_item = jnp.dtype(out_dtype).itemsize

    budget, stat_limit, vmem_cap = _vmem_params()
    fused_tile_limit = 8 << 20      # per-tile limit for the K-tiled weight

    # Lane-dense padded output width; MXU-width aware (>=256-wide output tiles
    # whenever output_dim > 128).
    dp = 128 if d_out <= 128 else _round_up(d_out, 256)

    scale = (1.0 / k) if aggr_method == "mean" else 1.0

    def pick_tdo(contract):
        # Keep the whole weight resident (constant j block index -> DMA'd once)
        # when it fits the stationary limit; otherwise MXU-wide tiles.
        if 2 * _round_up(contract, 8) * dp * w_item <= stat_limit:
            return dp
        if dp % 512 == 0:
            return 512
        if dp % 256 == 0:
            return 256
        return 128

    lane_dense = (d_in % 128 == 0)

    if lane_dense:
        mode = "lane"
        contract_w = d_in
        x_in = neighbor_features.reshape(n, k * d_in)
        w_big = weight
    elif aggr_method != "max":
        # Per-tile fuse decision: tdo first, then the (K*Din, tdo) tile size.
        tdo_probe = pick_tdo(k * d_in)
        if 2 * _round_up(k * d_in, 8) * tdo_probe * w_item <= fused_tile_limit:
            mode = "fused"
            contract_w = k * d_in
            x_in = neighbor_features.reshape(n, k * d_in)
            # TODO(synk): hoist this K-tiled weight to a one-time precompute
            # when the weight is static across calls.
            w_big = jnp.tile(weight, (k, 1))
        else:
            mode = "reduce"
    else:
        mode = "reduce"

    if mode == "reduce":
        contract_w = d_in
        x_in = neighbor_features
        w_big = weight

    tdo = pick_tdo(contract_w)

    if dp != d_out:
        w_big = jnp.pad(w_big, ((0, 0), (0, dp - d_out)))

    # ---- node tiling under the generation-aware VMEM budget ----
    sub_pack = max(8, 32 // x_item)          # 8 f32 / 16 bf16 / 32 int8
    if mode == "reduce":
        # account for layout padding of the (tn, K, Din) tile
        per_row = (2 * _round_up(k, sub_pack) * _round_up(d_in, 128) * x_item
                   + 2 * tdo * o_item)
    else:
        per_row = 2 * _round_up(k * d_in, 128) * x_item + 2 * tdo * o_item
    stationary = 2 * _round_up(contract_w, 8) * tdo * w_item
    if use_bias:
        stationary += 2 * 8 * tdo * 4

    tn = (budget - stationary) // max(per_row, 1)
    tn = int(max(min(tn, 1024), sub_pack))
    if tn >= n:
        tn = n                                # full first dim -> no constraint
    else:
        tn = max((tn // sub_pack) * sub_pack, sub_pack)
    grid = (pl.cdiv(n, tn), dp // tdo)

    # ---- kernel + specs ----
    if mode == "lane":
        x_spec = pl.BlockSpec((tn, k * d_in), lambda i, j: (i, 0))
        kernel = functools.partial(_lane_reduce_kernel, k=k, d_in=d_in,
                                   aggr=aggr_method, scale=scale)
    elif mode == "fused":
        x_spec = pl.BlockSpec((tn, k * d_in), lambda i, j: (i, 0))
        kernel = functools.partial(_fused_kernel, scale=scale)
    else:
        x_spec = pl.BlockSpec((tn, k, d_in), lambda i, j: (i, 0, 0))
        kernel = functools.partial(_reduce_kernel, aggr=aggr_method, scale=scale)

    in_specs = [x_spec, pl.BlockSpec((contract_w, tdo), lambda i, j: (0, j))]
    args = [x_in, w_big]
    if use_bias:
        b_pad = bias.astype(jnp.float32).reshape(1, d_out)
        if dp != d_out:
            b_pad = jnp.pad(b_pad, ((0, 0), (0, dp - d_out)))
        args.append(b_pad)
        in_specs.append(pl.BlockSpec((1, tdo), lambda i, j: (0, j)))

    mxu_contract = k * d_in if mode == "fused" else d_in
    cost = pl.CostEstimate(
        flops=2 * n * mxu_contract * dp + n * k * d_in,
        transcendentals=0,
        bytes_accessed=(x_in.size * x_item + w_big.size * w_item
                        + n * dp * o_item + (dp * 4 if use_bias else 0)),
    )
    vmem_limit = int(min(max(stationary + tn * per_row + (4 << 20), 32 << 20),
                         vmem_cap))

    out_padded = pl.pallas_call(
        kernel,
        out_shape=jax.ShapeDtypeStruct((n, dp), out_dtype),
        grid_spec=pltpu.PrefetchScalarGridSpec(
            num_scalar_prefetch=0,
            grid=grid,
            in_specs=in_specs,
            out_specs=pl.BlockSpec((tn, tdo), lambda i, j: (i, j)),
        ),
        compiler_params=pltpu.CompilerParams(
            dimension_semantics=("parallel", "parallel"),
            vmem_limit_bytes=vmem_limit,
        ),
        cost_estimate=cost,
    )(*args)

    return out_padded if dp == d_out else out_padded[:, :d_out]


def init_parameters(key, input_dim, output_dim, use_bias=True):
    """Kaiming-normal init mimicking nn.init.kaiming_normal_
    (fan_in mode on a [input_dim, output_dim] tensor -> fan = output_dim)."""
    std = (2.0 / output_dim) ** 0.5
    weight = jax.random.normal(key, (input_dim, output_dim), jnp.float32) * std
    bias = jnp.zeros((output_dim,), jnp.float32) if use_bias else None
    return weight, bias


if __name__ == "__main__":
    key = jax.random.PRNGKey(0)

    def run_case(n, k, d_in, d_out, aggr, use_bias, case_key):
        k_x, k_w = jax.random.split(case_key)
        x = jax.random.normal(k_x, (n, k, d_in), jnp.float32)
        w, b = init_parameters(k_w, d_in, d_out, use_bias)
        out = jax.block_until_ready(
            neighbor_aggregator(x, w, b, aggr_method=aggr))
        if aggr == "mean":
            ref = jnp.mean(x, axis=1) @ w
        elif aggr == "sum":
            ref = jnp.sum(x, axis=1) @ w
        else:
            ref = jnp.max(x, axis=1) @ w
        if use_bias:
            ref = ref + b
        assert out.shape == (n, d_out)
        assert jnp.allclose(out, ref, atol=1e-4, rtol=1e-4), (aggr, d_in, d_out)

    keys = jax.random.split(key, 6)
    # Din not 128-aligned: fused K-tiled-weight path (mean/sum) + 3-D reduce (max)
    run_case(64, 8, 32, 64, "mean", True, keys[0])
    run_case(64, 8, 32, 64, "sum", True, keys[1])
    run_case(64, 8, 32, 64, "max", False, keys[2])
    # Din 128-aligned: lane-dense in-kernel reduction path for all three aggrs
    run_case(64, 8, 128, 64, "mean", True, keys[3])
    run_case(64, 8, 128, 64, "sum", False, keys[4])
    run_case(64, 8, 128, 64, "max", True, keys[5])

    print("KERNEL_OK")
</pallas_src>

<mosaic_0001>
module attributes {stable_mosaic.version = 11 : i64} {
  func.func @_fused_kernel(%arg0: i32, %arg1: i32, %arg2: memref<64x256xf32, #tpu.memory_space<vmem>>, %arg3: memref<256x128xf32, #tpu.memory_space<vmem>>, %arg4: memref<1x128xf32, #tpu.memory_space<vmem>>, %arg5: memref<64x128xf32, #tpu.memory_space<vmem>>) attributes {dimension_semantics = [#tpu.dimension_semantics<parallel>, #tpu.dimension_semantics<parallel>], iteration_bounds = array<i64: 1, 1>, scalar_prefetch = 0 : i64, scratch_operands = 0 : i64, tpu.core_type = #tpu.core_type<tc>, window_params = [{transform_indices = @transform_0, window_bounds = array<i64: 64, 256>}, {transform_indices = @transform_1, window_bounds = array<i64: 256, 128>}, {transform_indices = @transform_2, window_bounds = array<i64: 1, 128>}, {transform_indices = @transform_3, window_bounds = array<i64: 64, 128>}]} {
    %c0 = arith.constant 0 : index
    %c0_0 = arith.constant 0 : index
    %0 = vector.load %arg2[%c0, %c0_0] : memref<64x256xf32, #tpu.memory_space<vmem>>, vector<64x256xf32>
    %c0_1 = arith.constant 0 : index
    %c0_2 = arith.constant 0 : index
    %1 = vector.load %arg3[%c0_1, %c0_2] : memref<256x128xf32, #tpu.memory_space<vmem>>, vector<256x128xf32>
    %cst = arith.constant dense<0.000000e+00> : vector<64x128xf32>
    %2 = tpu.matmul %0, %1, %cst {dimension_numbers = #tpu.dot_dimension_numbers<[1], [0], [0], [1], [0, 0, 1, 1], [], []>} : vector<64x256xf32>, vector<256x128xf32>, vector<64x128xf32> -> vector<64x128xf32>
    %cst_3 = arith.constant 1.250000e-01 : f32
    %3 = vector.broadcast %cst_3 : f32 to vector<64x128xf32>
    %4 = arith.mulf %2, %3 : vector<64x128xf32>
    %c0_4 = arith.constant 0 : index
    %c0_5 = arith.constant 0 : index
    %5 = vector.load %arg4[%c0_4, %c0_5] : memref<1x128xf32, #tpu.memory_space<vmem>>, vector<1x128xf32>
    %6 = vector.broadcast %5 : vector<1x128xf32> to vector<64x128xf32>
    %7 = arith.addf %4, %6 : vector<64x128xf32>
    %c0_6 = arith.constant 0 : index
    %c0_7 = arith.constant 0 : index
    %8 = vector.load %arg5[%c0_6, %c0_7] : memref<64x128xf32, #tpu.memory_space<vmem>>, vector<64x128xf32>
    tpu.vector_store %arg5[%c0_6, %c0_7], %7 {strides = array<i32>} : memref<64x128xf32, #tpu.memory_space<vmem>>, vector<64x128xf32>,
    return
  }
  func.func @transform_0(%arg0: i32, %arg1: i32) -> (i32, i32) {
    %c0_i32 = arith.constant 0 : i32
    %c0_i32_0 = arith.constant 0 : i32
    return %arg0, %c0_i32 : i32, i32
  }
  func.func @transform_1(%arg0: i32, %arg1: i32) -> (i32, i32) {
    %c0_i32 = arith.constant 0 : i32
    %c0_i32_0 = arith.constant 0 : i32
    return %c0_i32, %arg1 : i32, i32
  }
  func.func @transform_2(%arg0: i32, %arg1: i32) -> (i32, i32) {
    %c0_i32 = arith.constant 0 : i32
    %c0_i32_0 = arith.constant 0 : i32
    return %c0_i32, %arg1 : i32, i32
  }
  func.func @transform_3(%arg0: i32, %arg1: i32) -> (i32, i32) {
    %c0_i32 = arith.constant 0 : i32
    return %arg0, %arg1 : i32, i32
  }
}

</mosaic_0001>

<bundles_post_ra>
// kernel: tpu_custom_call.1
= control target key start
LH: loop header
LB: loop body
LE: loop exit
PB: predicated region body
PF: predicated region fallthrough
CT: control target
= control target key end

     0   :  { %8 = vsyncpa [#allocation3], 0  ;;  %s501_s0 = inlined_call_operand.hbm [shape: f32[64,256], index: 0, kind: input, shape index: {}]   ;;  %s502_s1 = inlined_call_operand.hbm [shape: f32[256,128], index: 1, kind: input, shape index: {}]   ;;  %s503_s2 = inlined_call_operand.vmem [shape: f32[1,128], index: 2, kind: input, shape index: {}]   ;;  %s504_s3 = inlined_call_operand.hbm [shape: f32[64,128], index: 3, kind: output, shape index: {}]  }
   0x1   :  { %9 = vsyncpa [#allocation6], 0 }
   0x2   :  { %10 = vsyncpa [#allocation4], 0  ;;  %s429_s12 = smov [#allocation2]   ;;  %s357_s16 = scalar_lea.hbm %s501_s0, 2048 }
   0x3   :  { %s16_s13 = sshll.u32 %s429_s12, 4  ;;  %p358_p0 = scmp.ne.s32.totalorder %s501_s0, %s357_s16  ;;  %s17_s13 = int_to_ptr.vmem [resolvable:$true] %s16_s13 }
   0x4   :  { %p361_p1 = scmp.lt.u32.totalorder %s357_s16, %s501_s0 }
   0x6   :  { %p363_p2 = pnand %p361_p1, %p358_p0 }
   0x8   :  { %366 = shalt.err (!%p363_p2)
}
   0x9   :  { %s367_s21 = scalar_lea.vmem %s17_s13, 2048  ;;  %p372_p4 = scmp.lt.s32.totalorder %s17_s13, %s17_s13 }
   0xa   :  { %p368_p3 = scmp.ne.s32.totalorder %s17_s13, %s367_s21  ;;  %p373_p5 = scmp.lt.s32.totalorder %s367_s21, %s367_s21 }
   0xc   :  { %p374_p6 = por %p373_p5, %p372_p4 }
   0xe   :  { %p375_p7 = pnand %p374_p6, %p368_p3 }
  0x10   :  { %378 = shalt.err (!%p375_p7)
}
  0x11   :  { %s430_s22 = smov 256   ;;  %s431_s23 = smov 16  }
  0x12   :  { %22 = dma.hbm_to_vmem [thread:$0]  %s501_s0, 2048, %s17_s13, [#allocation3], %s430_s22, %s430_s22, %s431_s23  }
  0x13   :  { %s432_s26 = smov [#allocation5]   ;;  %s379_s30 = scalar_lea.hbm %s502_s1, 4096 }
  0x14   :  { %s28_s27 = sshll.u32 %s432_s26, 4  ;;  %p380_p8 = scmp.ne.s32.totalorder %s502_s1, %s379_s30  ;;  %s29_s27 = int_to_ptr.vmem [resolvable:$true] %s28_s27 }
  0x15   :  { %p383_p9 = scmp.lt.u32.totalorder %s379_s30, %s502_s1 }
  0x17   :  { %p385_p10 = pnand %p383_p9, %p380_p8 }
  0x19   :  { %388 = shalt.err (!%p385_p10)
}
  0x1a   :  { %s389_s8 = scalar_lea.vmem %s29_s27, 4096  ;;  %p394_p12 = scmp.lt.s32.totalorder %s29_s27, %s29_s27 }
  0x1b   :  { %p390_p11 = scmp.ne.s32.totalorder %s29_s27, %s389_s8  ;;  %p395_p13 = scmp.lt.s32.totalorder %s389_s8, %s389_s8 }
  0x1d   :  { %p396_p0 = por %p395_p13, %p394_p12 }
  0x1f   :  { %p397_p1 = pnand %p396_p0, %p390_p11 }
  0x21   :  { %400 = shalt.err (!%p397_p1)
}
  0x22   :  { %s433_s0 = smov 128   ;;  %s434_s9 = smov 8  }
  0x23   :  { %34 = dma.hbm_to_vmem [thread:$0]  %s502_s1, 4096, %s29_s27, [#allocation6], %s433_s0, %s433_s0, %s434_s9  }
  0x24   :  { %423 = dma.done.wait [#allocation3], 2048  }
  0x25   :  { %424 = vsyncadd [#allocation3], 4294965248 }
  0x26   :  { %425 = dma.done.wait [#allocation6], 4096  }
  0x27   :  { %426 = vsyncadd [#allocation6], 4294963200  ;;  %v75_v0 = vld [vmem:[#allocation5 + $0x80] sm:$0xff]  ;;  %v76_v1 = vld [vmem:[#allocation5 + $0x88] sm:$0xff] }
  0x28   :  { %v59_v2 = vld [vmem:[#allocation5] sm:$0xff]  ;;  %v302_v3 = vpack.c.bf16 %v76_v1, %v75_v0  ;;  %v60_v4 = vld [vmem:[#allocation5 + $0x8] sm:$0xff]  ;;  %v77_v5 = vld [vmem:[#allocation5 + $0x90] sm:$0xff] }
  0x29   :  { %v78_v6 = vld [vmem:[#allocation5 + $0x98] sm:$0xff]  ;;  %v304_v7 = vpack.c.bf16 %v60_v4, %v59_v2  ;;  %v61_v9 = vld [vmem:[#allocation5 + $0x10] sm:$0xff]  ;;  %v79_v11 = vld [vmem:[#allocation5 + $0xa0] sm:$0xff] }
  0x2a   :  { %v306_v8 = vpack.c.bf16 %v78_v6, %v77_v5  ;;  %v62_v10 = vld [vmem:[#allocation5 + $0x18] sm:$0xff]  ;;  %303 = vmatprep.subr.bf16.mxu0 %v302_v3  ;;  %334 = vmatprep.subr.bf16.mxu1 %v302_v3  ;;  %v80_v12 = vld [vmem:[#allocation5 + $0xa8] sm:$0xff]  ;;  %v63_v15 = vld [vmem:[#allocation5 + $0x20] sm:$0xff] }
  0x2b   :  { %305 = vmatpush3.bf16.msra.mxu0 %v304_v7  ;;  %342 = vmatpush3.bf16.msra.mxu1 %v304_v7  ;;  %v308_v13 = vpack.c.bf16 %v62_v10, %v61_v9  ;;  %v310_v14 = vpack.c.bf16 %v80_v12, %v79_v11  ;;  %v64_v16 = vld [vmem:[#allocation5 + $0x28] sm:$0xff]  ;;  %v81_v17 = vld [vmem:[#allocation5 + $0xb0] sm:$0xff]  ;;  %v82_v18 = vld [vmem:[#allocation5 + $0xb8] sm:$0xff] }
  0x2c   :  { %307 = vmatprep.subr.bf16.mxu0 %v306_v8  ;;  %335 = vmatprep.subr.bf16.mxu1 %v306_v8  ;;  %v312_v19 = vpack.c.bf16 %v64_v16, %v63_v15  ;;  %v314_v20 = vpack.c.bf16 %v82_v18, %v81_v17  ;;  %v65_v21 = vld [vmem:[#allocation5 + $0x30] sm:$0xff]  ;;  %v66_v22 = vld [vmem:[#allocation5 + $0x38] sm:$0xff]  ;;  %v83_v23 = vld [vmem:[#allocation5 + $0xc0] sm:$0xff] }
  0x2d   :  { %v84_v24 = vld [vmem:[#allocation5 + $0xc8] sm:$0xff]  ;;  %v316_v27 = vpack.c.bf16 %v66_v22, %v65_v21  ;;  %v67_v29 = vld [vmem:[#allocation5 + $0x40] sm:$0xff]  ;;  %v85_v31 = vld [vmem:[#allocation5 + $0xd0] sm:$0xff] }
  0x2e   :  { %v44_v25 = vld [vmem:[#allocation2 + $0x8] sm:$0xff]  ;;  %v318_v28 = vpack.c.bf16 %v84_v24, %v83_v23  ;;  %v86_v32 = vld [vmem:[#allocation5 + $0xd8] sm:$0xff]  ;;  %v69_v35 = vld [vmem:[#allocation5 + $0x50] sm:$0xff] }
  0x2f   :  { %309 = vmatpush3.bf16.msra.mxu0 %v308_v13  ;;  %343 = vmatpush3.bf16.msra.mxu1 %v308_v13  ;;  %v52_v26 = vld [vmem:[#allocation2 + $0x48] sm:$0xff]  ;;  %v322_v34 = vpack.c.bf16 %v86_v32, %v85_v31  ;;  %v70_v36 = vld [vmem:[#allocation5 + $0x58] sm:$0xff]  ;;  %v87_v37 = vld [vmem:[#allocation5 + $0xe0] sm:$0xff] }
  0x30   :  { %311 = vmatprep.subr.bf16.mxu0 %v310_v14  ;;  %336 = vmatprep.subr.bf16.mxu1 %v310_v14  ;;  %v68_v30 = vld [vmem:[#allocation5 + $0x48] sm:$0xff]  ;;  %v324_v39 = vpack.c.bf16 %v70_v36, %v69_v35  ;;  %v71_v41 = vld [vmem:[#allocation5 + $0x60] sm:$0xff]  ;;  %v89_v43 = vld [vmem:[#allocation5 + $0xf0] sm:$0xff] }
  0x31   :  { %155 = vmatprep.mubr.f32.mxu0 %v44_v25  ;;  %175 = vmatprep.mubr.f32.mxu1 %v52_v26  ;;  %v320_v33 = vpack.c.bf16 %v68_v30, %v67_v29  ;;  %v88_v38 = vld [vmem:[#allocation5 + $0xe8] sm:$0xff]  ;;  %v90_v44 = vld [vmem:[#allocation5 + $0xf8] sm:$0xff]  ;;  %v73_v47 = vld [vmem:[#allocation5 + $0x70] sm:$0xff] }
  0x32   :  { %v326_v40 = vpack.c.bf16 %v88_v38, %v87_v37  ;;  %v72_v42 = vld [vmem:[#allocation5 + $0x68] sm:$0xff]  ;;  %v330_v46 = vpack.c.bf16 %v90_v44, %v89_v43  ;;  %v74_v48 = vld [vmem:[#allocation5 + $0x78] sm:$0xff]  ;;  %v43_v50 = vld [vmem:[#allocation2] sm:$0xff] }
  0x33   :  { %313 = vmatpush3.bf16.msra.mxu0 %v312_v19  ;;  %344 = vmatpush3.bf16.msra.mxu1 %v312_v19  ;;  %v328_v45 = vpack.c.bf16 %v72_v42, %v71_v41  ;;  %v332_v49 = vpack.c.bf16 %v74_v48, %v73_v47  ;;  %v51_v51 = vld [vmem:[#allocation2 + $0x40] sm:$0xff]  ;;  %v46_v52 = vld [vmem:[#allocation2 + $0x18] sm:$0xff]  ;;  %v45_v54 = vld [vmem:[#allocation2 + $0x10] sm:$0xff] }
  0x34   :  { %315 = vmatprep.subr.bf16.mxu0 %v314_v20  ;;  %337 = vmatprep.subr.bf16.mxu1 %v314_v20  ;;  %v54_v53 = vld [vmem:[#allocation2 + $0x58] sm:$0xff]  ;;  %v53_v55 = vld [vmem:[#allocation2 + $0x50] sm:$0xff]  ;;  %v48_v56 = vld [vmem:[#allocation2 + $0x28] sm:$0xff] }
  0x35   :  { %v56_v57 = vld [vmem:[#allocation2 + $0x68] sm:$0xff]  ;;  %v47_v58 = vld [vmem:[#allocation2 + $0x20] sm:$0xff]  ;;  %v50_v60 = vld [vmem:[#allocation2 + $0x38] sm:$0xff] }
  0x36   :  { %v55_v59 = vld [vmem:[#allocation2 + $0x60] sm:$0xff]  ;;  %v58_v61 = vld [vmem:[#allocation2 + $0x78] sm:$0xff]  ;;  %v49_v62 = vld [vmem:[#allocation2 + $0x30] sm:$0xff] }
  0x37   :  { %317 = vmatpush3.bf16.msra.mxu0 %v316_v27  ;;  %345 = vmatpush3.bf16.msra.mxu1 %v316_v27  ;;  %v57_v63 = vld [vmem:[#allocation2 + $0x70] sm:$0xff]  ;;  %v245_v6 = vld [vmem:[%s503_s2] ss:$0 sm:$0xff]  ;;  %s435_s2 = smov [#allocation7]  }
  0x38   :  { %319 = vmatprep.subr.bf16.mxu0 %v318_v28  ;;  %338 = vmatprep.subr.bf16.mxu1 %v318_v28  ;;  %s232_s13 = sshll.u32 %s435_s2, 4  ;;  %s233_s13 = int_to_ptr.vmem [resolvable:$true] %s232_s13 }
  0x39   :  { %s401_s14 = scalar_lea.vmem %s233_s13, 1024  ;;  %p406_p3 = scmp.lt.s32.totalorder %s233_s13, %s233_s13 }
  0x3a   :  { %p402_p2 = scmp.ne.s32.totalorder %s233_s13, %s401_s14  ;;  %p407_p4 = scmp.lt.s32.totalorder %s401_s14, %s401_s14 }
  0x3b   :  { %321 = vmatpush3.bf16.msra.mxu0 %v320_v33  ;;  %346 = vmatpush3.bf16.msra.mxu1 %v320_v33 }
  0x3c   :  { %323 = vmatprep.subr.bf16.mxu0 %v322_v34  ;;  %339 = vmatprep.subr.bf16.mxu1 %v322_v34  ;;  %p408_p5 = por %p407_p4, %p406_p3 }
  0x3e   :  { %p409_p6 = pnand %p408_p5, %p402_p2 }
  0x3f   :  { %325 = vmatpush3.bf16.msra.mxu0 %v324_v39  ;;  %347 = vmatpush3.bf16.msra.mxu1 %v324_v39 }
  0x40   :  { %327 = vmatprep.subr.bf16.mxu0 %v326_v40  ;;  %340 = vmatprep.subr.bf16.mxu1 %v326_v40 }
  0x43   :  { %329 = vmatpush3.bf16.msra.mxu0 %v328_v45  ;;  %348 = vmatpush3.bf16.msra.mxu1 %v328_v45 }
  0x44   :  { %331 = vmatprep.subr.bf16.mxu0 %v330_v46  ;;  %341 = vmatprep.subr.bf16.mxu1 %v330_v46 }
  0x47   :  { %333 = vmatpush3.bf16.msra.mxu0 %v332_v49  ;;  %349 = vmatpush3.bf16.msra.mxu1 %v332_v49 }
  0x4a   :  { %156 = vmatmul.mubr.f32.vlgmr.msra.gmra.mrb[0].mxu0 %v43_v50  ;;  %176 = vmatmul.mubr.f32.vlgmr.msra.gmra.mrb[0].mxu1 %v51_v51 }
  0x4b   :  { %160 = vmatprep.mubr.f32.mxu0 %v46_v52  ;;  %180 = vmatprep.mubr.f32.mxu1 %v54_v53 }
  0x4e   :  { %161 = vmatmul.mubr.f32.gmra.mrb[2].mxu0 %v45_v54  ;;  %181 = vmatmul.mubr.f32.gmra.mrb[2].mxu1 %v53_v55 }
  0x4f   :  { %165 = vmatprep.mubr.f32.mxu0 %v48_v56  ;;  %185 = vmatprep.mubr.f32.mxu1 %v56_v57 }
  0x52   :  { %166 = vmatmul.mubr.f32.gmra.mrb[4].mxu0 %v47_v58  ;;  %186 = vmatmul.mubr.f32.gmra.mrb[4].mxu1 %v55_v59 }
  0x53   :  { %170 = vmatprep.mubr.f32.mxu0 %v50_v60  ;;  %190 = vmatprep.mubr.f32.mxu1 %v58_v61 }
  0x56   :  { %171 = vmatmul.mubr.f32.gmra.mrb[6].mxu0 %v49_v62  ;;  %191 = vmatmul.mubr.f32.gmra.mrb[6].mxu1 %v57_v63 }
 0x11d   :  { %v278_v0 = vpop.f32.mrb[0].mxu0  ;;  %v290_v1 = vpop.f32.mrb[0].mxu1 }
 0x11e   :  { %v279_v2 = vpop.f32.mrb[1].mxu0  ;;  %v291_v3 = vpop.f32.mrb[1].mxu1 }
 0x11f   :  { %v280_v4 = vadd.f32 %v279_v2, %v278_v0  ;;  %v292_v5 = vadd.f32 %v291_v3, %v290_v1 }
 0x121   :  { %v196_v7 = vmul.f32 0.125, %v280_v4  ;;  %v200_v8 = vmul.f32 0.125, %v292_v5  ;;  %v281_v9 = vpop.f32.mrb[2].mxu0  ;;  %v293_v10 = vpop.f32.mrb[2].mxu1 }
 0x122   :  { %v282_v11 = vpop.f32.mrb[3].mxu0  ;;  %v294_v12 = vpop.f32.mrb[3].mxu1 }
 0x123   :  { %v211_v13 = vadd.f32 %v245_v6, %v196_v7  ;;  %v215_v14 = vadd.f32 %v245_v6, %v200_v8  ;;  %v283_v15 = vadd.f32 %v282_v11, %v281_v9  ;;  %v295_v16 = vadd.f32 %v294_v12, %v293_v10 }
 0x125   :  { %219 = vst [vmem:[#allocation7] sm:$0xff] %v211_v13  ;;  %223 = vst [vmem:[#allocation7 + $0x20] sm:$0xff] %v215_v14  ;;  %v197_v17 = vmul.f32 0.125, %v283_v15  ;;  %v201_v18 = vmul.f32 0.125, %v295_v16  ;;  %v284_v19 = vpop.f32.mrb[4].mxu0  ;;  %v296_v20 = vpop.f32.mrb[4].mxu1 }
 0x126   :  { %v285_v21 = vpop.f32.mrb[5].mxu0  ;;  %v297_v22 = vpop.f32.mrb[5].mxu1 }
 0x127   :  { %v212_v23 = vadd.f32 %v245_v6, %v197_v17  ;;  %v216_v24 = vadd.f32 %v245_v6, %v201_v18  ;;  %v286_v25 = vadd.f32 %v285_v21, %v284_v19  ;;  %v298_v26 = vadd.f32 %v297_v22, %v296_v20 }
 0x129   :  { %220 = vst [vmem:[#allocation7 + $0x8] sm:$0xff] %v212_v23  ;;  %224 = vst [vmem:[#allocation7 + $0x28] sm:$0xff] %v216_v24  ;;  %v198_v27 = vmul.f32 0.125, %v286_v25  ;;  %v202_v28 = vmul.f32 0.125, %v298_v26  ;;  %v287_v29 = vpop.f32.mrb[6].mxu0  ;;  %v299_v30 = vpop.f32.mrb[6].mxu1 }
 0x12a   :  { %v288_v31 = vpop.f32.mrb[7].mxu0  ;;  %v300_v32 = vpop.f32.mrb[7].mxu1 }
 0x12b   :  { %v213_v33 = vadd.f32 %v245_v6, %v198_v27  ;;  %v217_v34 = vadd.f32 %v245_v6, %v202_v28  ;;  %v289_v35 = vadd.f32 %v288_v31, %v287_v29  ;;  %v301_v36 = vadd.f32 %v300_v32, %v299_v30 }
 0x12d   :  { %221 = vst [vmem:[#allocation7 + $0x10] sm:$0xff] %v213_v33  ;;  %225 = vst [vmem:[#allocation7 + $0x30] sm:$0xff] %v217_v34  ;;  %v199_v37 = vmul.f32 0.125, %v289_v35  ;;  %v203_v38 = vmul.f32 0.125, %v301_v36 }
 0x12f   :  { %v214_v39 = vadd.f32 %v245_v6, %v199_v37  ;;  %v218_v40 = vadd.f32 %v245_v6, %v203_v38 }
 0x131   :  { %222 = vst [vmem:[#allocation7 + $0x18] sm:$0xff] %v214_v39  ;;  %226 = vst [vmem:[#allocation7 + $0x38] sm:$0xff] %v218_v40 }
 0x132   :  { %412 = shalt.err (!%p409_p6)
}
 0x133   :  { %s413_s17 = scalar_lea.hbm %s504_s3, 1024 }
 0x134   :  { %p414_p7 = scmp.ne.s32.totalorder %s504_s3, %s413_s17  ;;  %p417_p8 = scmp.lt.u32.totalorder %s413_s17, %s504_s3 }
 0x136   :  { %p419_p9 = pnand %p417_p8, %p414_p7 }
 0x138   :  { %422 = shalt.err (!%p419_p9)
}
 0x139   :  { %238 = dma.vmem_to_hbm [thread:$0]  %s233_s13, 1024, %s504_s3, [#allocation4], %s433_s0, %s433_s0, %s434_s9  }
 0x13a   :  { %427 = dma.done.wait [#allocation4], 1024  }
 0x13b   :  { %428 = vsyncadd [#allocation4], 4294966272 }
 0x13c   :  { %242 = vsyncpa [#allocation3], 1 }
 0x13d   :  { %243 = vsyncpa [#allocation6], 1 }
 0x13e   :  { %244 = vsyncpa [#allocation4], 1 }

</bundles_post_ra>
